<compile_context>
chip_gen: v7x
topology: tpu7x:2x2x1
jax: 0.10.0
libtpu: 0.0.40
codegen_flags: <defaults>
</compile_context>

<pallas_src>
import jax
import jax.numpy as jnp
import numpy as np
from jax.experimental import pallas as pl
from jax.experimental.pallas import tpu as pltpu

# Fixed color-conversion matrices (deterministic "parameters").
RGB_TO_LHM = np.array(
    [[0.2989, 0.587, 0.114],
     [0.3, 0.04, -0.35],
     [0.34, -0.6, 0.17]],
    dtype=np.float32,
)
RGB_TO_LMN = np.array(
    [[0.06, 0.63, 0.27],
     [0.3, 0.04, -0.35],
     [0.34, -0.6, 0.17]],
    dtype=np.float32,
)
RGB_TO_YIQ = np.array(
    [[0.299, 0.587, 0.114],
     [0.5969, -0.2746, -0.3213],
     [0.2115, -0.5227, 0.3112]],
    dtype=np.float32,
)

_WEIGHTS = {
    ("RGB", "YIQ"): RGB_TO_YIQ,
    ("RGB", "Y"): RGB_TO_YIQ[:1],
    ("RGB", "LHM"): RGB_TO_LHM,
    ("RGB", "LMN"): RGB_TO_LMN,
    ("RGB", "L"): RGB_TO_LMN[:1],
}

_LANES = 128
# ~12 MiB of (input + output) HBM traffic per grid step: >> 0.35 us step
# overhead on every generation, and double-buffered blocks stay ~24 MiB.
_TARGET_STEP_BYTES = 12 * 1024 * 1024
# Explicit scoped-VMEM limit: above v5e's 16 MiB default, well under v7x's
# 64 MiB physical VMEM.
_VMEM_LIMIT_BYTES = 40 * 1024 * 1024


def _make_color_kernel(weight_rows, bias_vals):
    """Build a kernel with the (C_out, C_in) weights baked in as constants."""
    c_out = len(weight_rows)
    c_in = len(weight_rows[0])

    def kernel(x_ref, o_ref):
        # x_ref: (b_tile, c_in, s_tile, 128); o_ref: (b_tile, c_out, s_tile, 128).
        # Load each input channel plane once (lane/sublane dense).
        chans = [x_ref[:, ci, :, :].astype(jnp.float32) for ci in range(c_in)]
        for co in range(c_out):
            acc = weight_rows[co][0] * chans[0]
            for ci in range(1, c_in):
                acc = acc + weight_rows[co][ci] * chans[ci]
            if bias_vals is not None:
                acc = acc + bias_vals[co]
            # In-place per-channel store: no concatenate, no XLU relayout.
            o_ref[:, co, :, :] = acc.astype(o_ref.dtype)

    return kernel


def color_conv(x: jax.Array, weight, bias=None) -> jax.Array:
    """Color convolution: x (N, C, *), weight (C', C) -> (N, C', *)."""
    w = np.asarray(weight, dtype=np.float32)
    assert w.ndim == 2, "weight must be (C_out, C_in)"
    c_out, c_in = w.shape
    assert x.ndim >= 2 and x.shape[1] == c_in, "x must be (N, C_in, *)"

    weight_rows = tuple(tuple(float(v) for v in row) for row in w)
    bias_vals = None
    if bias is not None:
        bias_vals = tuple(float(v) for v in np.asarray(bias, dtype=np.float32))
        assert len(bias_vals) == c_out

    n = x.shape[0]
    spatial = x.shape[2:]
    p = int(np.prod(spatial)) if spatial else 1
    itemsize = jnp.dtype(x.dtype).itemsize

    # Flatten pixels; pad once to a 128 multiple (a no-op for typical image
    # sizes: 224*224, 256*256, ... are already multiples of 128), then view as
    # dense (rows, 128) planes per channel.
    x_flat = x.reshape(n, c_in, p)
    p_pad = -(-p // _LANES) * _LANES
    if p_pad != p:
        x_flat = jnp.pad(x_flat, ((0, 0), (0, 0), (0, p_pad - p)))
    rows = p_pad // _LANES
    x4 = x_flat.reshape(n, c_in, rows, _LANES)

    # Tile sizing: keep each grid step around _TARGET_STEP_BYTES of in+out
    # traffic and guarantee a multi-step grid for DMA/compute overlap.
    bytes_per_row = (c_in + c_out) * _LANES * itemsize   # one row-of-128 pixels
    per_image_bytes = rows * bytes_per_row

    if per_image_bytes > _TARGET_STEP_BYTES:
        # Big images: one image per step, split the rows (multiple of 8, Pallas
        # masks the ragged last row block).
        b_tile = 1
        s_tile = max(8, (_TARGET_STEP_BYTES // bytes_per_row) // 8 * 8)
        s_tile = min(s_tile, rows)
    else:
        # Small images: whole image per step, pack several images per step to
        # amortize per-step overhead, but keep >= ~4 batch steps when possible.
        s_tile = rows
        b_tile = min(n, max(1, _TARGET_STEP_BYTES // max(per_image_bytes, 1)))
        b_tile = min(b_tile, max(1, -(-n // 4)))

    grid = (pl.cdiv(n, b_tile), pl.cdiv(rows, s_tile))

    out4 = pl.pallas_call(
        _make_color_kernel(weight_rows, bias_vals),
        out_shape=jax.ShapeDtypeStruct((n, c_out, rows, _LANES), x.dtype),
        grid_spec=pltpu.PrefetchScalarGridSpec(
            num_scalar_prefetch=0,
            grid=grid,
            in_specs=[
                pl.BlockSpec((b_tile, c_in, s_tile, _LANES),
                             lambda i, t: (i, 0, t, 0)),
            ],
            out_specs=pl.BlockSpec((b_tile, c_out, s_tile, _LANES),
                                   lambda i, t: (i, 0, t, 0)),
        ),
        compiler_params=pltpu.CompilerParams(
            dimension_semantics=("parallel", "parallel"),
            vmem_limit_bytes=_VMEM_LIMIT_BYTES,
        ),
    )(x4)

    # Free reshape back; drop the pad tail if any.
    out_flat = out4.reshape(n, c_out, p_pad)
    if p_pad != p:
        out_flat = out_flat[:, :, :p]
    return out_flat.reshape((n, c_out) + spatial)


class ColorConv:
    """JAX/Pallas equivalent of piqa's ColorConv module (no bias)."""

    def __init__(self, src: str, dst: str):
        assert (src, dst) in _WEIGHTS, f"Unknown {src} to {dst} conversion"
        self.weight = jnp.asarray(_WEIGHTS[(src, dst)])

    def __call__(self, x: jax.Array) -> jax.Array:
        return color_conv(x, self.weight)


if __name__ == "__main__":
    key = jax.random.PRNGKey(0)
    # Small shapes consistent with the module: RGB image batch, NCHW.
    N, C, H, W = 2, 3, 16, 16
    x = jax.random.uniform(key, (N, C, H, W), dtype=jnp.float32)

    # RGB -> YIQ (C_out = 3).
    conv = ColorConv("RGB", "YIQ")
    y = jax.block_until_ready(conv(x))
    ref = jnp.einsum("oc,nchw->nohw", conv.weight, x)
    assert y.shape == (N, 3, H, W)
    assert jnp.allclose(y, ref, atol=1e-5, rtol=1e-5)

    # RGB -> Y (C_out = 1) exercises the single-output-channel path.
    conv_y = ColorConv("RGB", "Y")
    y1 = jax.block_until_ready(conv_y(x))
    ref1 = jnp.einsum("oc,nchw->nohw", conv_y.weight, x)
    assert y1.shape == (N, 1, H, W)
    assert jnp.allclose(y1, ref1, atol=1e-5, rtol=1e-5)

    # Ragged spatial size (P % 128 != 0) exercises the one-time-pad tail path.
    x_odd = jax.random.uniform(jax.random.PRNGKey(1), (2, 3, 5, 7), dtype=jnp.float32)
    y_odd = jax.block_until_ready(conv(x_odd))
    ref_odd = jnp.einsum("oc,nchw->nohw", conv.weight, x_odd)
    assert y_odd.shape == (2, 3, 5, 7)
    assert jnp.allclose(y_odd, ref_odd, atol=1e-5, rtol=1e-5)

    print("KERNEL_OK")
</pallas_src>

<mosaic_0001>
module attributes {stable_mosaic.version = 11 : i64} {
  func.func @kernel(%arg0: i32, %arg1: i32, %arg2: memref<1x3x2x128xf32, #tpu.memory_space<vmem>>, %arg3: memref<1x3x2x128xf32, #tpu.memory_space<vmem>>) attributes {dimension_semantics = [#tpu.dimension_semantics<parallel>, #tpu.dimension_semantics<parallel>], iteration_bounds = array<i64: 2, 1>, scalar_prefetch = 0 : i64, scratch_operands = 0 : i64, tpu.core_type = #tpu.core_type<tc>, window_params = [{transform_indices = @transform_0, window_bounds = array<i64: 1, 3, 2, 128>}, {transform_indices = @transform_1, window_bounds = array<i64: 1, 3, 2, 128>}]} {
    %c0 = arith.constant 0 : index
    %c0_0 = arith.constant 0 : index
    %c0_1 = arith.constant 0 : index
    %c0_2 = arith.constant 0 : index
    %0 = vector.load %arg2[%c0, %c0_0, %c0_1, %c0_2] : memref<1x3x2x128xf32, #tpu.memory_space<vmem>>, vector<1x1x2x128xf32>
    %1 = vector.shape_cast %0 : vector<1x1x2x128xf32> to vector<1x2x128xf32>
    %c0_3 = arith.constant 0 : index
    %c1 = arith.constant 1 : index
    %c0_4 = arith.constant 0 : index
    %c0_5 = arith.constant 0 : index
    %2 = vector.load %arg2[%c0_3, %c1, %c0_4, %c0_5] : memref<1x3x2x128xf32, #tpu.memory_space<vmem>>, vector<1x1x2x128xf32>
    %3 = vector.shape_cast %2 : vector<1x1x2x128xf32> to vector<1x2x128xf32>
    %c0_6 = arith.constant 0 : index
    %c2 = arith.constant 2 : index
    %c0_7 = arith.constant 0 : index
    %c0_8 = arith.constant 0 : index
    %4 = vector.load %arg2[%c0_6, %c2, %c0_7, %c0_8] : memref<1x3x2x128xf32, #tpu.memory_space<vmem>>, vector<1x1x2x128xf32>
    %5 = vector.shape_cast %4 : vector<1x1x2x128xf32> to vector<1x2x128xf32>
    %cst = arith.constant 2.990000e-01 : f32
    %6 = vector.broadcast %cst : f32 to vector<1x2x128xf32>
    %7 = arith.mulf %6, %1 : vector<1x2x128xf32>
    %cst_9 = arith.constant 5.870000e-01 : f32
    %8 = vector.broadcast %cst_9 : f32 to vector<1x2x128xf32>
    %9 = arith.mulf %8, %3 : vector<1x2x128xf32>
    %10 = arith.addf %7, %9 : vector<1x2x128xf32>
    %cst_10 = arith.constant 1.140000e-01 : f32
    %11 = vector.broadcast %cst_10 : f32 to vector<1x2x128xf32>
    %12 = arith.mulf %11, %5 : vector<1x2x128xf32>
    %13 = arith.addf %10, %12 : vector<1x2x128xf32>
    %c0_11 = arith.constant 0 : index
    %c0_12 = arith.constant 0 : index
    %c0_13 = arith.constant 0 : index
    %c0_14 = arith.constant 0 : index
    %14 = vector.load %arg3[%c0_11, %c0_12, %c0_13, %c0_14] : memref<1x3x2x128xf32, #tpu.memory_space<vmem>>, vector<1x1x2x128xf32>
    %15 = vector.shape_cast %14 : vector<1x1x2x128xf32> to vector<1x2x128xf32>
    %16 = vector.shape_cast %13 : vector<1x2x128xf32> to vector<1x1x2x128xf32>
    tpu.vector_store %arg3[%c0_11, %c0_12, %c0_13, %c0_14], %16 {strides = array<i32>} : memref<1x3x2x128xf32, #tpu.memory_space<vmem>>, vector<1x1x2x128xf32>,
    %cst_15 = arith.constant 5.969000e-01 : f32
    %17 = vector.broadcast %cst_15 : f32 to vector<1x2x128xf32>
    %18 = arith.mulf %17, %1 : vector<1x2x128xf32>
    %cst_16 = arith.constant -2.746000e-01 : f32
    %19 = vector.broadcast %cst_16 : f32 to vector<1x2x128xf32>
    %20 = arith.mulf %19, %3 : vector<1x2x128xf32>
    %21 = arith.addf %18, %20 : vector<1x2x128xf32>
    %cst_17 = arith.constant -3.213000e-01 : f32
    %22 = vector.broadcast %cst_17 : f32 to vector<1x2x128xf32>
    %23 = arith.mulf %22, %5 : vector<1x2x128xf32>
    %24 = arith.addf %21, %23 : vector<1x2x128xf32>
    %c0_18 = arith.constant 0 : index
    %c1_19 = arith.constant 1 : index
    %c0_20 = arith.constant 0 : index
    %c0_21 = arith.constant 0 : index
    %25 = vector.load %arg3[%c0_18, %c1_19, %c0_20, %c0_21] : memref<1x3x2x128xf32, #tpu.memory_space<vmem>>, vector<1x1x2x128xf32>
    %26 = vector.shape_cast %25 : vector<1x1x2x128xf32> to vector<1x2x128xf32>
    %27 = vector.shape_cast %24 : vector<1x2x128xf32> to vector<1x1x2x128xf32>
    tpu.vector_store %arg3[%c0_18, %c1_19, %c0_20, %c0_21], %27 {strides = array<i32>} : memref<1x3x2x128xf32, #tpu.memory_space<vmem>>, vector<1x1x2x128xf32>,
    %cst_22 = arith.constant 2.115000e-01 : f32
    %28 = vector.broadcast %cst_22 : f32 to vector<1x2x128xf32>
    %29 = arith.mulf %28, %1 : vector<1x2x128xf32>
    %cst_23 = arith.constant -5.227000e-01 : f32
    %30 = vector.broadcast %cst_23 : f32 to vector<1x2x128xf32>
    %31 = arith.mulf %30, %3 : vector<1x2x128xf32>
    %32 = arith.addf %29, %31 : vector<1x2x128xf32>
    %cst_24 = arith.constant 3.112000e-01 : f32
    %33 = vector.broadcast %cst_24 : f32 to vector<1x2x128xf32>
    %34 = arith.mulf %33, %5 : vector<1x2x128xf32>
    %35 = arith.addf %32, %34 : vector<1x2x128xf32>
    %c0_25 = arith.constant 0 : index
    %c2_26 = arith.constant 2 : index
    %c0_27 = arith.constant 0 : index
    %c0_28 = arith.constant 0 : index
    %36 = vector.load %arg3[%c0_25, %c2_26, %c0_27, %c0_28] : memref<1x3x2x128xf32, #tpu.memory_space<vmem>>, vector<1x1x2x128xf32>
    %37 = vector.shape_cast %36 : vector<1x1x2x128xf32> to vector<1x2x128xf32>
    %38 = vector.shape_cast %35 : vector<1x2x128xf32> to vector<1x1x2x128xf32>
    tpu.vector_store %arg3[%c0_25, %c2_26, %c0_27, %c0_28], %38 {strides = array<i32>} : memref<1x3x2x128xf32, #tpu.memory_space<vmem>>, vector<1x1x2x128xf32>,
    return
  }
  func.func @transform_0(%arg0: i32, %arg1: i32) -> (i32, i32, i32, i32) {
    %c0_i32 = arith.constant 0 : i32
    %c0_i32_0 = arith.constant 0 : i32
    %c0_i32_1 = arith.constant 0 : i32
    return %arg0, %c0_i32, %arg1, %c0_i32_0 : i32, i32, i32, i32
  }
  func.func @transform_1(%arg0: i32, %arg1: i32) -> (i32, i32, i32, i32) {
    %c0_i32 = arith.constant 0 : i32
    %c0_i32_0 = arith.constant 0 : i32
    %c0_i32_1 = arith.constant 0 : i32
    return %arg0, %c0_i32, %arg1, %c0_i32_0 : i32, i32, i32, i32
  }
}

</mosaic_0001>

<bundles_post_ra>
// kernel: tpu_custom_call.1
= control target key start
LH: loop header
LB: loop body
LE: loop exit
PB: predicated region body
PF: predicated region fallthrough
CT: control target
= control target key end

     0   :  { %6 = vsyncpa [#allocation3], 0  ;;  %s665_s0 = inlined_call_operand.hbm [shape: f32[2,3,2,128], index: 0, kind: input, shape index: {}]   ;;  %s666_s1 = inlined_call_operand.hbm [shape: f32[2,3,2,128], index: 1, kind: output, shape index: {}]  }
   0x1   :  { %8 = vsyncpa [#allocation3 + $0x1], 0 }
   0x2   :  { %9 = vsyncpa [#allocation4], 0 }
   0x3   :  { %11 = vsyncpa [#allocation4 + $0x1], 0  ;;  %s490_s6 = smov 0   ;;  %s492_s7 = smov 0  }
   0x4   :  { %s494_s8 = smov 0   ;;  %s496_s9 = smov 0  }
   0x5   :  { %s498_s10 = smov 0   ;;  %s500_s11 = smov 0  }
   0x6 LB: > { %s277_s12 = sadd.s32 4294967295, %s472_s11   ;;  %s278_s13 = sadd.s32 4294967294, %s472_s11   ;;  %s472_s11 = sphi %s500_s11, %s17_s11   ;;  %s468_s10 = sphi %s498_s10, %s681_s10   ;;  %s464_s9 = sphi %s496_s9, %s680_s9   ;;  %s460_s8 = sphi %s494_s8, %s679_s8   ;;  %s456_s7 = sphi %s492_s7, %s678_s7   ;;  %s452_s6 = sphi %s490_s6, %s677_s6  }
   0x7   : > { %s29_s14 = sadd.s32 1, %s468_s10  ;;  %s38_s15 = sadd.s32 1, %s460_s8 }
   0x8   : > { %p31_p0 = scmp.ge.s32.totalorder %s29_s14, 2  ;;  %p45_p1 = scmp.ne.s32.totalorder %s460_s8, %s456_s7 }
   0x9   : > { %p46_p2 = scmp.eq.s32.totalorder %s472_s11, 0  ;;  %p51_p3 = scmp.ne.s32.totalorder %s456_s7, %s452_s6 }
   0xa   : > { %s683_s14 = smov (%p31_p0, %s29_s14), 0  ;;  %p52_p5 = scmp.eq.s32.totalorder %s277_s12, 0 }
   0xb   : > { %p531_p4 = por %p46_p2, %p45_p1  ;;  %s33_s17 = ssub.s32 %s468_s10, %s683_s14 }
   0xc   : > { %p77_p6 = scmp.eq.s32.totalorder %s277_s12, 1  ;;  %p36_p7 = scmp.eq.s32.totalorder %s33_s17, 0 }
   0xd   : > { %p537_p8 = por %p52_p5, %p51_p3  ;;  %p83_p10 = scmp.eq.s32.totalorder %s278_s13, 1 }
   0xe   : > { %p541_p9 = por %p77_p6, %p45_p1  ;;  %p306_p13 = scmp.lt.s32.totalorder %s472_s11, 2 }
   0xf   : > { %s546_s20 = scalar_select %p36_p7, %s460_s8, %s38_s15  }
  0x10   : > { %s670_s19 = scalar_select %p541_p9, 1, 0 }
  0x11   : > { %p548_p11 = por %p83_p10, %p51_p3  ;;  %s103_s22 = sand.u32 1, %s460_s8  }
  0x12   : > { %s290_s23 = smul.u32 6, %s103_s22  ;;  %p558_p0 = pnand %p306_p13, %p531_p4 }
  0x13   : > { %s671_s21 = scalar_select %p548_p11, 1, 0 }
  0x14   : > { %s291_s24 = smul.u32 96, %s468_s10  ;;  %s107_s29 = scalar_lea.vmem [#allocation2], %s290_s23 }
  0x15   : > { %s115_s30 = sshll.u32 %s107_s29, 4  ;;  %s570_s2 = scalar_lea.sflag [#allocation3], %s103_s22  ;;  %s567_s30 = int_to_ptr.vmem [resolvable:$true] %s115_s30 }
  0x16   : > { %s565_s28 = scalar_lea.hbm %s665_s0, %s291_s24  ;;  %p362_p3 = pneg %p558_p0 }
  0x17   : > { %s360_s3 = scalar_lea.hbm %s565_s28, 96  ;;  %s365_s12 = scalar_lea.hbm %s665_s0, 192 }
  0x18   : > { %p361_p2 = scmp.ne.s32.totalorder %s565_s28, %s360_s3  ;;  %p366_p6 = scmp.lt.u32.totalorder %s565_s28, %s665_s0 }
  0x19   : > { %p367_p7 = scmp.lt.u32.totalorder %s365_s12, %s360_s3  ;;  %p369_p13 = scmp.lt.u32.totalorder %s360_s3, %s565_s28 }
  0x1a   : > { %p363_p4 = pnand %p362_p3, %p361_p2 }
  0x1b   : > { %p368_p10 = por %p367_p7, %p366_p6 }
  0x1c   : > { %p364_p5 = pneg %p363_p4 }
  0x1d   : > { %p370_p12 = por %p369_p13, %p368_p10 }
  0x1f   : > { %p371_p1 = pnand %p370_p12, %p364_p5 }
  0x21   : > { %374 = shalt.err (!%p371_p1)
}
  0x22   : > { %s375_s16 = scalar_lea.vmem %s567_s30, 96  ;;  %s474_s17 = smov [#allocation2]  }
  0x23   : > { %p376_p2 = scmp.ne.s32.totalorder %s567_s30, %s375_s16  ;;  %s380_s22 = sshll.u32 %s474_s17, 4  ;;  %s381_s22 = int_to_ptr.vmem [resolvable:$false] %s380_s22 }
  0x24   : > { %s382_s23 = scalar_lea.vmem %s381_s22, 192  ;;  %p383_p9 = scmp.lt.s32.totalorder %s567_s30, %s381_s22 }
  0x25   : > { %p378_p4 = pnand %p376_p2, %p362_p3  ;;  %p384_p6 = scmp.lt.s32.totalorder %s382_s23, %s375_s16 }
  0x27   : > { %p379_p11 = pneg %p378_p4  ;;  %p385_p7 = por %p384_p6, %p383_p9 }
  0x29   : > { %p386_p10 = pnand %p385_p7, %p379_p11 }
  0x2b   : > { %389 = shalt.err (!%p386_p10)
}
  0x2c   : > { %s475_s24 = smov 32   ;;  %s476_s26 = smov 2  }
  0x2d   : > { %301 = dma.hbm_to_vmem [thread:$0]  (!%p558_p0), %s565_s28, 96, %s567_s30, %s570_s2, %s475_s24, %s475_s24, %s476_s26  }
  0x2e   : > { %p123_p12 = scmp.lt.s32.totalorder %s472_s11, 3  ;;  %p673_p1 = scmp.ge.s32.totalorder %s472_s11, 1 }
  0x30   : > { %p124_p3 = pnand %p673_p1, %p123_p12 }
  0x31   : > { %s602_s27 = sand.u32 (!%p124_p3), 1, %s456_s7  }
  0x32   : > { %127 = sbr.rel (%p124_p3) target bundleno = 87 (0x57), region = 24  ;;  %s130_s3 = scalar_lea.sflag (!%p124_p3), [#allocation3], %s602_s27 }
  0x33   : > { %s292_s29 = smul.u32 (!%p124_p3), 6, %s602_s27 }
  0x35   : > { %s133_s4 = scalar_lea.vmem (!%p124_p3), [#allocation2], %s292_s29 }
  0x39   : > { %443 = dma.done.wait (%p537_p8), %s130_s3, 96  }
  0x3a   : > { %445 = vsyncadd (%p537_p8), %s130_s3, 4294967200  ;;  %s151_s25 = scalar_lea.vmem [#allocation5], %s292_s29  ;;  %s293_s30 = smul.u32 96, %s464_s9  ;;  %v152_v0 = vld [vmem:[%s133_s4] sm:$0x3] }
  0x3b   : > { %s192_s28 = sshll.u32 %s151_s25, 4  ;;  %v283_v1 = vld [vmem:[%s133_s4 + $0x2] sm:$0x3]  ;;  %v284_v2 = vld [vmem:[%s133_s4 + $0x4] sm:$0x3]  ;;  %s178_s5 = scalar_lea.sflag [#allocation4], %s602_s27  ;;  %s611_s28 = int_to_ptr.vmem [resolvable:$true] %s192_s28 }
  0x3c   : > { %v157_v3 = vmul.f32 0.299, %v152_v0  ;;  %v158_v4 = vmul.f32 0.587, %v283_v1  ;;  %v160_v5 = vmul.f32 0.114, %v284_v2  ;;  %s616_s2 = scalar_lea.hbm %s666_s1, %s293_s30 }
  0x3d   : > { %v163_v6 = vmul.f32 0.5969, %v152_v0  ;;  %v164_v7 = vmul.f32 -0.2746, %v283_v1  ;;  %v166_v8 = vmul.f32 -0.3213, %v284_v2 }
  0x3e   : > { %v159_v9 = vadd.f32 %v158_v4, %v157_v3  ;;  %v170_v10 = vmul.f32 0.2115, %v152_v0  ;;  %v171_v11 = vmul.f32 -0.5227, %v283_v1  ;;  %v173_v12 = vmul.f32 0.3112, %v284_v2 }
  0x3f   : > { %v165_v13 = vadd.f32 %v164_v7, %v163_v6  ;;  %s390_s12 = scalar_lea.vmem %s611_s28, 96  ;;  %p674_p9 = scmp.ne.s32.totalorder %s670_s19, 0 }
  0x40   : > { %v161_v14 = vadd.f32 %v160_v5, %v159_v9  ;;  %v172_v15 = vadd.f32 %v171_v11, %v170_v10  ;;  %p391_p8 = scmp.ne.s32.totalorder %s611_s28, %s390_s12  ;;  %s477_s13 = smov [#allocation5]  }
  0x41   : > { %v167_v16 = vadd.f32 %v166_v8, %v165_v13  ;;  %s394_s15 = sshll.u32 %s477_s13, 4  ;;  %s395_s15 = int_to_ptr.vmem [resolvable:$false] %s394_s15 }
  0x42   : > { %162 = vst [vmem:[%s151_s25] sm:$0x3] %v161_v14  ;;  %v174_v17 = vadd.f32 %v173_v12, %v172_v15  ;;  %p392_p11 = pnand %p391_p8, %p674_p9  ;;  %s396_s16 = scalar_lea.vmem %s395_s15, 192 }
  0x43   : > { %285 = vst [vmem:[%s151_s25 + $0x2] sm:$0x3] %v167_v16  ;;  %p397_p5 = scmp.lt.s32.totalorder %s611_s28, %s395_s15  ;;  %p398_p13 = scmp.lt.s32.totalorder %s396_s16, %s390_s12 }
  0x44   : > { %286 = vst [vmem:[%s151_s25 + $0x4] sm:$0x3] %v174_v17  ;;  %p393_p0 = pneg %p392_p11 }
  0x45   : > { %p399_p2 = por %p398_p13, %p397_p5 }
  0x47   : > { %p400_p4 = pnand %p399_p2, %p393_p0 }
  0x49   : > { %403 = shalt.err (!%p400_p4)
}
  0x4a   : > { %s404_s17 = scalar_lea.hbm %s616_s2, 96  ;;  %s408_s24 = scalar_lea.hbm %s666_s1, 192 }
  0x4b   : > { %p405_p6 = scmp.ne.s32.totalorder %s616_s2, %s404_s17  ;;  %p409_p12 = scmp.lt.u32.totalorder %s616_s2, %s666_s1 }
  0x4c   : > { %p410_p1 = scmp.lt.u32.totalorder %s408_s24, %s404_s17  ;;  %p412_p8 = scmp.lt.u32.totalorder %s404_s17, %s616_s2 }
  0x4d   : > { %p406_p7 = pnand %p405_p6, %p674_p9 }
  0x4e   : > { %p411_p3 = por %p410_p1, %p409_p12 }
  0x4f   : > { %p407_p10 = pneg %p406_p7 }
  0x50   : > { %p413_p11 = por %p412_p8, %p411_p3 }
  0x52   : > { %p414_p0 = pnand %p413_p11, %p407_p10 }
  0x54   : > { %417 = shalt.err (!%p414_p0)
}
  0x55   : > { %s478_s3 = smov 32   ;;  %s479_s4 = smov 2  }
  0x56   : > { %296 = dma.vmem_to_hbm [thread:$0]  (%p674_p9), %s611_s28, 96, %s616_s2, %s178_s5, %s478_s3, %s478_s3, %s479_s4  }
  0x57 PF: > { %s207_s25 = sand.u32 1, %s452_s6   ;;  %p675_p5 = scmp.ne.s32.totalorder %s671_s21, 0 }
  0x58   : > { %p676_p13 = scmp.ge.s32.totalorder %s472_s11, 2  ;;  %s208_s30 = scalar_lea.sflag [#allocation4], %s207_s25 }
  0x5a   : > { %p303_p2 = pnand %p676_p13, %p675_p5 }
  0x5c   : > { %447 = dma.done.wait (!%p303_p2), %s208_s30, 96  }
  0x5d   : > { %449 = vsyncadd (!%p303_p2), %s208_s30, 4294967200  ;;  %s17_s11 = sadd.s32 1, %s472_s11   ;;  %s677_s6 = smov %s456_s7 }
  0x5e   : > { %p14_p4 = scmp.ge.s32.totalorder %s17_s11, 4   ;;  %s678_s7 = smov %s460_s8 }
  0x5f   : > { %s679_s8 = smov %s546_s20  ;;  %s680_s9 = smov %s468_s10 }
  0x60   : > { %s681_s10 = smov %s683_s14  ;;  %16 = sbr.rel (!%p14_p4) target bundleno = 6 (0x6), region = 73 }
  0x67   :  { %213 = vsyncpa [#allocation3], 1 }
  0x68   :  { %215 = vsyncpa [#allocation3 + $0x1], 1 }
  0x69   :  { %216 = vsyncpa [#allocation4], 1 }
  0x6a   :  { %218 = vsyncpa [#allocation4 + $0x1], 1 }

</bundles_post_ra>
